<compile_context>
chip_gen: v7x
topology: tpu7x:2x2x1
jax: 0.10.0
libtpu: 0.0.40
codegen_flags: <defaults>
</compile_context>

<pallas_src>
import jax
import jax.numpy as jnp
from jax.experimental import pallas as pl
from jax.experimental.pallas import tpu as pltpu

# ---------------- module configuration (matches __init__ args) ----------------
EMB_SIZE = 32
NUM_RADIAL = 8
NUM_DENSE = 2
NUM_TARGETS = 4
ACTIVATION = None          # module default; the linear fold requires None

# ---------------- synthetic graph sizes (small but grid-exercising) ------------
NUM_EDGES = 512
NUM_NODES = 64
NUM_GRAPHS = 8

# ---------------- tiling ----------------
EDGE_TILE = 128            # edge rows per grid step (>=128 for vreg/MXU use)
GRAPH_TILE = 8             # graphs per output block (sublane-aligned)
TARGET_PAD = 128           # lane-dense output width; real targets sliced out


def _round_up(x, m):
    return (x + m - 1) // m * m


def output_block_kernel(rbf_ref, m_ref, eg_ref, w_rbf_ref, w_comb_ref,
                        b_comb_ref, counts_ref, out_ref, agg_ref):
    gi = pl.program_id(0)          # graph tile (parallel)
    k = pl.program_id(1)           # edge tile (reduction, arbitrary)

    @pl.when(k == 0)
    def _():
        agg_ref[...] = jnp.zeros_like(agg_ref)

    # tmp[e] = m[e] * dense_rbf(rbf[e])                      (EDGE_TILE, emb)
    rbf_proj = jnp.dot(rbf_ref[...], w_rbf_ref[...],
                       preferred_element_type=jnp.float32)
    tmp = (m_ref[...].astype(jnp.float32) * rbf_proj).astype(jnp.bfloat16)

    # one-hot segment matrix S[g, e] = [graph(dst(e)) == gi*GRAPH_TILE + g]
    g_ids = jax.lax.broadcasted_iota(jnp.int32, (GRAPH_TILE, EDGE_TILE), 0)
    g_ids = g_ids + gi * GRAPH_TILE
    seg = jnp.where(g_ids == eg_ref[...], 1.0, 0.0).astype(jnp.bfloat16)

    # edge->graph segment sum (copy_e+sum fused with sum readout), f32 accum
    agg_ref[...] += jnp.dot(seg, tmp, preferred_element_type=jnp.float32)

    # finalize: fused dense chain + per-graph node count * bias, lane-dense store
    @pl.when(k == pl.num_programs(1) - 1)
    def _():
        proj = jnp.dot(agg_ref[...].astype(jnp.bfloat16), w_comb_ref[...],
                       preferred_element_type=jnp.float32)
        out_ref[...] = proj + counts_ref[...] * b_comb_ref[...]


def output_block(rbf, m, edge_dst, node_graph, num_graphs,
                 W_rbf, W_layers, b_layers, W_final, activation=None):
    """OutputBlock forward on a batched graph.

    rbf: (E, num_radial) f32, m: (E, emb) f32,
    edge_dst: (E,) int32 destination node of each edge,
    node_graph: (N,) int32 graph id of each node,
    W_rbf: (num_radial, emb), W_layers: (num_dense, emb, emb),
    b_layers: (num_dense, emb), W_final: (emb, num_targets)  -- x @ W convention.
    """
    if activation is not None:
        # TODO(synk): a non-linear activation breaks the W/b fold; that path
        # needs a per-node segment sum before the dense layers (not implemented).
        raise NotImplementedError("fused kernel assumes activation is None")

    E, num_radial = rbf.shape
    emb = m.shape[1]
    num_targets = W_final.shape[1]
    num_dense = int(W_layers.shape[0])

    # ---- fold the (linear) dense chain:  t @ W_comb + b_comb ----
    if num_dense == 0:
        W_comb = W_final
        b_comb = jnp.zeros((num_targets,), jnp.float32)
    else:
        W_comb = W_layers[0]
        b_comb = b_layers[0]
        for i in range(1, num_dense):
            W_comb = W_comb @ W_layers[i]
            b_comb = b_comb @ W_layers[i] + b_layers[i]
        W_comb = W_comb @ W_final                 # (emb, num_targets)
        b_comb = b_comb @ W_final                 # (num_targets,)

    # ---- pad: edges -> EDGE_TILE, graphs -> GRAPH_TILE, targets -> 128 ----
    E_pad = _round_up(E, EDGE_TILE)
    G_pad = _round_up(num_graphs, GRAPH_TILE)

    edge_graph = node_graph[edge_dst].astype(jnp.int32)             # (E,)
    edge_graph = jnp.pad(edge_graph, (0, E_pad - E), constant_values=-1)
    edge_graph = edge_graph.reshape(1, E_pad)

    counts = jnp.zeros((G_pad,), jnp.float32).at[node_graph].add(1.0)
    counts = counts.reshape(G_pad, 1)

    rbf_p = jnp.pad(rbf, ((0, E_pad - E), (0, 0))).astype(jnp.bfloat16)
    m_p = jnp.pad(m, ((0, E_pad - E), (0, 0))).astype(jnp.bfloat16)

    W_comb_p = jnp.zeros((emb, TARGET_PAD), jnp.float32).at[:, :num_targets].set(W_comb)
    b_comb_p = jnp.zeros((1, TARGET_PAD), jnp.float32).at[0, :num_targets].set(b_comb)

    w_rbf_bf = W_rbf.astype(jnp.bfloat16)
    w_comb_bf = W_comb_p.astype(jnp.bfloat16)

    n_gt = G_pad // GRAPH_TILE
    n_et = E_pad // EDGE_TILE

    # advisory cost estimate (helps XLA schedule around the custom call)
    flops = (n_gt * n_et * (2 * EDGE_TILE * num_radial * emb
                            + EDGE_TILE * emb
                            + 2 * GRAPH_TILE * EDGE_TILE * emb)
             + n_gt * 2 * GRAPH_TILE * emb * TARGET_PAD)
    bytes_accessed = (rbf_p.size * 2 + m_p.size * 2 + edge_graph.size * 4
                      + w_rbf_bf.size * 2 + w_comb_bf.size * 2
                      + b_comb_p.size * 4 + counts.size * 4
                      + G_pad * TARGET_PAD * 4)

    grid_spec = pltpu.PrefetchScalarGridSpec(
        num_scalar_prefetch=0,
        grid=(n_gt, n_et),
        in_specs=[
            pl.BlockSpec((EDGE_TILE, num_radial), lambda gi, k: (k, 0)),   # rbf
            pl.BlockSpec((EDGE_TILE, emb), lambda gi, k: (k, 0)),          # m
            pl.BlockSpec((1, EDGE_TILE), lambda gi, k: (0, k)),            # edge->graph ids
            pl.BlockSpec((num_radial, emb), lambda gi, k: (0, 0)),         # W_rbf
            pl.BlockSpec((emb, TARGET_PAD), lambda gi, k: (0, 0)),         # W_comb
            pl.BlockSpec((1, TARGET_PAD), lambda gi, k: (0, 0)),           # b_comb
            pl.BlockSpec((GRAPH_TILE, 1), lambda gi, k: (gi, 0)),          # node counts
        ],
        out_specs=pl.BlockSpec((GRAPH_TILE, TARGET_PAD), lambda gi, k: (gi, 0)),
        scratch_shapes=[pltpu.VMEM((GRAPH_TILE, emb), jnp.float32)],
    )

    out_full = pl.pallas_call(
        output_block_kernel,
        out_shape=jax.ShapeDtypeStruct((G_pad, TARGET_PAD), jnp.float32),
        grid_spec=grid_spec,
        compiler_params=pltpu.CompilerParams(
            dimension_semantics=("parallel", "arbitrary"),
            vmem_limit_bytes=32 * 1024 * 1024),
        cost_estimate=pl.CostEstimate(flops=int(flops), transcendentals=0,
                                      bytes_accessed=int(bytes_accessed)),
    )(rbf_p, m_p, edge_graph, w_rbf_bf, w_comb_bf, b_comb_p, counts)

    return out_full[:num_graphs, :num_targets]


def glorot_like(key, shape):
    # Deterministic stand-in for GlorotOrthogonal init (synthetic weights).
    fan_in, fan_out = shape[-2], shape[-1]
    scale = jnp.sqrt(2.0 / (fan_in + fan_out))
    return jax.random.normal(key, shape, dtype=jnp.float32) * scale


if __name__ == "__main__":
    key = jax.random.PRNGKey(0)
    keys = jax.random.split(key, 8)

    # ---- per-edge inputs + graph structure ----
    rbf = jax.random.normal(keys[0], (NUM_EDGES, NUM_RADIAL), dtype=jnp.float32)
    m = jax.random.normal(keys[1], (NUM_EDGES, EMB_SIZE), dtype=jnp.float32)
    edge_dst = jax.random.randint(keys[2], (NUM_EDGES,), 0, NUM_NODES, dtype=jnp.int32)
    node_graph = jnp.arange(NUM_NODES, dtype=jnp.int32) // (NUM_NODES // NUM_GRAPHS)

    # ---- parameters (x @ W convention). W_final is NONZERO in the test so the
    #      correctness check is not vacuous (module default output_init=zeros_
    #      would make everything identically zero). ----
    W_rbf = glorot_like(keys[3], (NUM_RADIAL, EMB_SIZE))
    W_layers = jnp.stack([glorot_like(k, (EMB_SIZE, EMB_SIZE))
                          for k in jax.random.split(keys[4], NUM_DENSE)])
    b_layers = 0.01 * jax.random.normal(keys[5], (NUM_DENSE, EMB_SIZE), dtype=jnp.float32)
    W_final = glorot_like(keys[6], (EMB_SIZE, NUM_TARGETS))

    out = output_block(rbf, m, edge_dst, node_graph, NUM_GRAPHS,
                       W_rbf, W_layers, b_layers, W_final, activation=ACTIVATION)
    out = jax.block_until_ready(out)
    assert out.shape == (NUM_GRAPHS, NUM_TARGETS)

    # ---- reference 1: exact module semantics, pure f32 (loose tolerance since
    #      the kernel runs its matmuls in bf16 with f32 accumulation) ----
    hp = jax.lax.Precision.HIGHEST
    tmp = m * jnp.dot(rbf, W_rbf, precision=hp)
    t = jnp.zeros((NUM_NODES, EMB_SIZE), jnp.float32).at[edge_dst].add(tmp)
    for i in range(NUM_DENSE):
        t = jnp.dot(t, W_layers[i], precision=hp) + b_layers[i]
        if ACTIVATION is not None:
            t = ACTIVATION(t)
    t = jnp.dot(t, W_final, precision=hp)
    ref_f32 = jnp.zeros((NUM_GRAPHS, NUM_TARGETS), jnp.float32).at[node_graph].add(t)
    assert jnp.allclose(out, ref_f32, rtol=5e-2, atol=5e-1), (out, ref_f32)

    # ---- reference 2: mimic the kernel's bf16 quantization points (tight) ----
    q = lambda x: x.astype(jnp.bfloat16).astype(jnp.float32)
    W_comb = W_layers[0]
    b_comb = b_layers[0]
    for i in range(1, NUM_DENSE):
        W_comb = W_comb @ W_layers[i]
        b_comb = b_comb @ W_layers[i] + b_layers[i]
    W_comb = W_comb @ W_final
    b_comb = b_comb @ W_final
    edge_graph = node_graph[edge_dst]
    counts = jnp.zeros((NUM_GRAPHS,), jnp.float32).at[node_graph].add(1.0)
    rbf_proj_q = jnp.dot(q(rbf), q(W_rbf), precision=hp)
    tmp_q = q(q(m) * rbf_proj_q)
    agg = jnp.zeros((NUM_GRAPHS, EMB_SIZE), jnp.float32).at[edge_graph].add(tmp_q)
    ref_q = jnp.dot(q(agg), q(W_comb), precision=hp) + counts[:, None] * b_comb[None, :]
    assert jnp.allclose(out, ref_q, rtol=1e-2, atol=1e-2), (out, ref_q)

    print("KERNEL_OK")
</pallas_src>

<mosaic_0001>
module attributes {stable_mosaic.version = 11 : i64} {
  func.func @output_block_kernel(%arg0: i32, %arg1: i32, %arg2: memref<128x8xbf16, #tpu.memory_space<vmem>>, %arg3: memref<128x32xbf16, #tpu.memory_space<vmem>>, %arg4: memref<1x128xi32, #tpu.memory_space<vmem>>, %arg5: memref<8x32xbf16, #tpu.memory_space<vmem>>, %arg6: memref<32x128xbf16, #tpu.memory_space<vmem>>, %arg7: memref<1x128xf32, #tpu.memory_space<vmem>>, %arg8: memref<8x1xf32, #tpu.memory_space<vmem>>, %arg9: memref<8x128xf32, #tpu.memory_space<vmem>>, %arg10: memref<8x32xf32, #tpu.memory_space<vmem>>) attributes {dimension_semantics = [#tpu.dimension_semantics<parallel>, #tpu.dimension_semantics<arbitrary>], iteration_bounds = array<i64: 1, 4>, scalar_prefetch = 0 : i64, scratch_operands = 1 : i64, tpu.core_type = #tpu.core_type<tc>, window_params = [{transform_indices = @transform_0, window_bounds = array<i64: 128, 8>}, {transform_indices = @transform_1, window_bounds = array<i64: 128, 32>}, {transform_indices = @transform_2, window_bounds = array<i64: 1, 128>}, {pipeline_mode = #tpu.pipeline_mode<synchronous>, transform_indices = @transform_3, window_bounds = array<i64: 8, 32>}, {pipeline_mode = #tpu.pipeline_mode<synchronous>, transform_indices = @transform_4, window_bounds = array<i64: 32, 128>}, {pipeline_mode = #tpu.pipeline_mode<synchronous>, transform_indices = @transform_5, window_bounds = array<i64: 1, 128>}, {transform_indices = @transform_6, window_bounds = array<i64: 8, 1>}, {transform_indices = @transform_7, window_bounds = array<i64: 8, 128>}]} {
    %c0_i32 = arith.constant 0 : i32
    %0 = arith.cmpi eq, %arg1, %c0_i32 : i32
    %1 = arith.extui %0 : i1 to i32
    %c0_i32_0 = arith.constant 0 : i32
    %2 = arith.cmpi ne, %1, %c0_i32_0 : i32
    scf.if %2 {
      %cst_16 = arith.constant 0.000000e+00 : f32
      %28 = vector.broadcast %cst_16 : f32 to vector<8x32xf32>
      %c0_17 = arith.constant 0 : index
      %c0_18 = arith.constant 0 : index
      %29 = vector.load %arg10[%c0_17, %c0_18] : memref<8x32xf32, #tpu.memory_space<vmem>>, vector<8x32xf32>
      tpu.vector_store %arg10[%c0_17, %c0_18], %28 {strides = array<i32>} : memref<8x32xf32, #tpu.memory_space<vmem>>, vector<8x32xf32>,
    } else {
    }
    %c0 = arith.constant 0 : index
    %c0_1 = arith.constant 0 : index
    %3 = vector.load %arg2[%c0, %c0_1] : memref<128x8xbf16, #tpu.memory_space<vmem>>, vector<128x8xbf16>
    %c0_2 = arith.constant 0 : index
    %c0_3 = arith.constant 0 : index
    %4 = vector.load %arg5[%c0_2, %c0_3] : memref<8x32xbf16, #tpu.memory_space<vmem>>, vector<8x32xbf16>
    %cst = arith.constant dense<0.000000e+00> : vector<128x32xf32>
    %5 = tpu.matmul %3, %4, %cst {dimension_numbers = #tpu.dot_dimension_numbers<[1], [0], [0], [1], [0, 0, 1, 1], [], []>} : vector<128x8xbf16>, vector<8x32xbf16>, vector<128x32xf32> -> vector<128x32xf32>
    %c0_4 = arith.constant 0 : index
    %c0_5 = arith.constant 0 : index
    %6 = vector.load %arg3[%c0_4, %c0_5] : memref<128x32xbf16, #tpu.memory_space<vmem>>, vector<128x32xbf16>
    %7 = arith.extf %6 : vector<128x32xbf16> to vector<128x32xf32>
    %8 = arith.mulf %7, %5 : vector<128x32xf32>
    %9 = arith.truncf %8 : vector<128x32xf32> to vector<128x32xbf16>
    %10 = tpu.iota {dimensions = array<i32: 0>} : vector<8x128xi32>
    %c8_i32 = arith.constant 8 : i32
    %11 = arith.muli %arg0, %c8_i32 : i32
    %12 = vector.broadcast %11 : i32 to vector<8x128xi32>
    %13 = arith.addi %10, %12 : vector<8x128xi32>
    %c0_6 = arith.constant 0 : index
    %c0_7 = arith.constant 0 : index
    %14 = vector.load %arg4[%c0_6, %c0_7] : memref<1x128xi32, #tpu.memory_space<vmem>>, vector<1x128xi32>
    %15 = vector.broadcast %14 : vector<1x128xi32> to vector<8x128xi32>
    %16 = arith.cmpi eq, %13, %15 : vector<8x128xi32>
    %cst_8 = arith.constant 1.000000e+00 : f32
    %cst_9 = arith.constant 0.000000e+00 : f32
    %17 = vector.broadcast %cst_8 : f32 to vector<8x128xf32>
    %18 = vector.broadcast %cst_9 : f32 to vector<8x128xf32>
    %19 = arith.select %16, %17, %18 : vector<8x128xi1>, vector<8x128xf32>
    %20 = arith.truncf %19 : vector<8x128xf32> to vector<8x128xbf16>
    %c0_10 = arith.constant 0 : index
    %c0_11 = arith.constant 0 : index
    %21 = vector.load %arg10[%c0_10, %c0_11] : memref<8x32xf32, #tpu.memory_space<vmem>>, vector<8x32xf32>
    %cst_12 = arith.constant dense<0.000000e+00> : vector<8x32xf32>
    %22 = tpu.matmul %20, %9, %cst_12 {dimension_numbers = #tpu.dot_dimension_numbers<[1], [0], [0], [1], [0, 0, 1, 1], [], []>} : vector<8x128xbf16>, vector<128x32xbf16>, vector<8x32xf32> -> vector<8x32xf32>
    %23 = arith.addf %21, %22 : vector<8x32xf32>
    %c0_13 = arith.constant 0 : index
    %c0_14 = arith.constant 0 : index
    %24 = vector.load %arg10[%c0_13, %c0_14] : memref<8x32xf32, #tpu.memory_space<vmem>>, vector<8x32xf32>
    tpu.vector_store %arg10[%c0_13, %c0_14], %23 {strides = array<i32>} : memref<8x32xf32, #tpu.memory_space<vmem>>, vector<8x32xf32>,
    %c3_i32 = arith.constant 3 : i32
    %25 = arith.cmpi eq, %arg1, %c3_i32 : i32
    %26 = arith.extui %25 : i1 to i32
    %c0_i32_15 = arith.constant 0 : i32
    %27 = arith.cmpi ne, %26, %c0_i32_15 : i32
    scf.if %27 {
      %c0_16 = arith.constant 0 : index
      %c0_17 = arith.constant 0 : index
      %28 = vector.load %arg10[%c0_16, %c0_17] : memref<8x32xf32, #tpu.memory_space<vmem>>, vector<8x32xf32>
      %29 = arith.truncf %28 : vector<8x32xf32> to vector<8x32xbf16>
      %c0_18 = arith.constant 0 : index
      %c0_19 = arith.constant 0 : index
      %30 = vector.load %arg6[%c0_18, %c0_19] : memref<32x128xbf16, #tpu.memory_space<vmem>>, vector<32x128xbf16>
      %cst_20 = arith.constant dense<0.000000e+00> : vector<8x128xf32>
      %31 = tpu.matmul %29, %30, %cst_20 {dimension_numbers = #tpu.dot_dimension_numbers<[1], [0], [0], [1], [0, 0, 1, 1], [], []>} : vector<8x32xbf16>, vector<32x128xbf16>, vector<8x128xf32> -> vector<8x128xf32>
      %c0_21 = arith.constant 0 : index
      %c0_22 = arith.constant 0 : index
      %32 = vector.load %arg8[%c0_21, %c0_22] : memref<8x1xf32, #tpu.memory_space<vmem>>, vector<8x1xf32>
      %c0_23 = arith.constant 0 : index
      %c0_24 = arith.constant 0 : index
      %33 = vector.load %arg7[%c0_23, %c0_24] : memref<1x128xf32, #tpu.memory_space<vmem>>, vector<1x128xf32>
      %34 = vector.broadcast %32 : vector<8x1xf32> to vector<8x128xf32>
      %35 = vector.broadcast %33 : vector<1x128xf32> to vector<8x128xf32>
      %36 = arith.mulf %34, %35 : vector<8x128xf32>
      %37 = arith.addf %31, %36 : vector<8x128xf32>
      %c0_25 = arith.constant 0 : index
      %c0_26 = arith.constant 0 : index
      %38 = vector.load %arg9[%c0_25, %c0_26] : memref<8x128xf32, #tpu.memory_space<vmem>>, vector<8x128xf32>
      tpu.vector_store %arg9[%c0_25, %c0_26], %37 {strides = array<i32>} : memref<8x128xf32, #tpu.memory_space<vmem>>, vector<8x128xf32>,
    } else {
    }
    return
  }
  func.func @transform_0(%arg0: i32, %arg1: i32) -> (i32, i32) {
    %c0_i32 = arith.constant 0 : i32
    %c0_i32_0 = arith.constant 0 : i32
    return %arg1, %c0_i32 : i32, i32
  }
  func.func @transform_1(%arg0: i32, %arg1: i32) -> (i32, i32) {
    %c0_i32 = arith.constant 0 : i32
    %c0_i32_0 = arith.constant 0 : i32
    return %arg1, %c0_i32 : i32, i32
  }
  func.func @transform_2(%arg0: i32, %arg1: i32) -> (i32, i32) {
    %c0_i32 = arith.constant 0 : i32
    %c0_i32_0 = arith.constant 0 : i32
    return %c0_i32, %arg1 : i32, i32
  }
  func.func @transform_3(%arg0: i32, %arg1: i32) -> (i32, i32) {
    %c0_i32 = arith.constant 0 : i32
    %c0_i32_0 = arith.constant 0 : i32
    %c0_i32_1 = arith.constant 0 : i32
    return %c0_i32, %c0_i32_0 : i32, i32
  }
  func.func @transform_4(%arg0: i32, %arg1: i32) -> (i32, i32) {
    %c0_i32 = arith.constant 0 : i32
    %c0_i32_0 = arith.constant 0 : i32
    %c0_i32_1 = arith.constant 0 : i32
    return %c0_i32, %c0_i32_0 : i32, i32
  }
  func.func @transform_5(%arg0: i32, %arg1: i32) -> (i32, i32) {
    %c0_i32 = arith.constant 0 : i32
    %c0_i32_0 = arith.constant 0 : i32
    %c0_i32_1 = arith.constant 0 : i32
    return %c0_i32, %c0_i32_0 : i32, i32
  }
  func.func @transform_6(%arg0: i32, %arg1: i32) -> (i32, i32) {
    %c0_i32 = arith.constant 0 : i32
    %c0_i32_0 = arith.constant 0 : i32
    return %arg0, %c0_i32 : i32, i32
  }
  func.func @transform_7(%arg0: i32, %arg1: i32) -> (i32, i32) {
    %c0_i32 = arith.constant 0 : i32
    %c0_i32_0 = arith.constant 0 : i32
    return %arg0, %c0_i32 : i32, i32
  }
}

</mosaic_0001>

<bundles_post_ra>
// kernel: tpu_custom_call.1
= control target key start
LH: loop header
LB: loop body
LE: loop exit
PB: predicated region body
PF: predicated region fallthrough
CT: control target
= control target key end

     0   :  { %12 = vsyncpa [#allocation4], 0  ;;  %s1111_s24 = smov 0   ;;  %s1113_s25 = smov 0   ;;  %s1235_s0 = inlined_call_operand.vmem [shape: bf16[512,8], index: 0, kind: input, shape index: {}]   ;;  %s1236_s1 = inlined_call_operand.vmem [shape: bf16[512,32], index: 1, kind: input, shape index: {}]   ;;  %s1237_s2 = inlined_call_operand.vmem [shape: s32[1,512], index: 2, kind: input, shape index: {}]   ;;  %s1238_s3 = inlined_call_operand.vmem [shape: bf16[8,32], index: 3, kind: input, shape index: {}]   ;;  %s1239_s4 = inlined_call_operand.vmem [shape: bf16[32,128], index: 4, kind: input, shape index: {}]   ;;  %s1240_s5 = inlined_call_operand.vmem [shape: f32[1,128], index: 5, kind: input, shape index: {}]   ;;  %s1241_s6 = inlined_call_operand.vmem [shape: f32[8,1], index: 6, kind: input, shape index: {}]   ;;  %s1242_s7 = inlined_call_operand.hbm [shape: f32[8,128], index: 7, kind: output, shape index: {}]  }
   0x1   :  { %s1115_s26 = smov 0  }
   0x2 LB: > { %s815_s27 = sadd.s32 4294967295, %s1061_s26   ;;  %s27_s28 = sadd.s32 1, %s1057_s25  ;;  %s1061_s26 = sphi %s1115_s26, %s18_s26   ;;  %s1057_s25 = sphi %s1113_s25, %s1245_s25   ;;  %s1053_s24 = sphi %s1111_s24, %s1244_s24  }
   0x3   : > { %p28_p0 = scmp.ge.s32.totalorder %s27_s28, 4  ;;  %p819_p1 = scmp.ge.s32.totalorder %s1061_s26, 1 }
   0x4   : > { %p279_p2 = scmp.lt.s32.totalorder %s1061_s26, 5 }
   0x5   : > { %s1247_s28 = smov (%p28_p0, %s27_s28), 0 }
   0x6   : > { %p280_p3 = pnand %p819_p1, %p279_p2 }
   0x7   : > { %s820_s29 = sshll.u32 (!%p280_p3), %s1053_s24, 4  ;;  %p330_p4 = scmp.lt.s32.totalorder (!%p280_p3), %s1053_s24, 3 }
   0x8   : > { %283 = sbr.rel (%p280_p3) target bundleno = 742 (0x2e6), region = 48  ;;  %p319_p5 = scmp.lt.s32.totalorder (!%p280_p3), %s820_s29, 63 }
   0x9   : > { %p824_p6 = scmp.ne.s32.totalorder (!%p280_p3), %s1053_s24, 0 }
   0xf   : > { %s1135_s30 = scalar_select %p330_p4, %s1053_s24, 3 }
  0x10   : > { %s1249_s29 = smov (!%p319_p5, %s820_s29), 63  ;;  %341 = sbr.rel (%p824_p6) target bundleno = 23 (0x17), region = 52 }
  0x11   : > { %s332_s10 = scalar_lea.vmem %s1237_s2, %s1135_s30  ;;  %s821_s11 = sshll.u32 %s1249_s29, 2  ;;  %vm342_vm0 = vcmask (!%p824_p6), 261120   ;;  %v1063_v0 = vmov (!%p824_p6), 0.0  }
  0x12   : > { %s322_s14 = scalar_lea.vmem %s1235_s0, %s821_s11  ;;  %s1147_s17 = scalar_lea.vmem %s1236_s1, %s821_s11  ;;  %343 = vst.msk [vmem:[#allocation2] sm:$0xff] (!%p824_p6), %vm342_vm0, %v1063_v0 }
  0x17 PF: > { %v360_v1 = vld [vmem:[%s1238_s3] sm:$0xf]  ;;  %vm426_vm1 = vcmask 1043456   ;;  %vm401_vm2 = vcmask 64512   ;;  %v999_v4 = vld [vmem:[%s322_s14 + $0x8] sm:$0xff]   ;;  %v1000_v5 = vld [vmem:[%s322_s14 + $0x10] sm:$0xff]  }
  0x18   : > { %v998_v2 = vld [vmem:[%s322_s14] sm:$0xff]   ;;  %959 = vmatprep.subr.msk.bf16.mxu0 %vm426_vm1, %v360_v1  ;;  %v428_v3 = vsel %vm426_vm1, %v360_v1, 0  ;;  %v1001_v6 = vld [vmem:[%s322_s14 + $0x18] sm:$0xff]   ;;  %v1003_v8 = vld [vmem:[%s322_s14 + $0x28] sm:$0xff]   ;;  %v1064_v11 = vmov 0.0   ;;  %vm1065_vm3 = vmmov 0  }
  0x19   : > { %914 = vmatpush3.bf16.msra.mxu0 %v428_v3  ;;  %915 = vmatprep.mubr.msk.bf16.mxu0 %vm401_vm2, %v998_v2  ;;  %v1002_v7 = vld [vmem:[%s322_s14 + $0x20] sm:$0xff]   ;;  %v1004_v9 = vld [vmem:[%s322_s14 + $0x30] sm:$0xff]   ;;  %v1005_v10 = vld [vmem:[%s322_s14 + $0x38] sm:$0xff]   ;;  %vm638_vm6 = vcmask 261120   ;;  %p844_p7 = scmp.ne.s32.totalorder %s1053_s24, 3 }
  0x1a   : > { %931 = vmatprep.subr.bf16.mxu1 %v1064_v11  ;;  %947 = vmatprep.mubr.msk.bf16.mxu1 %vm1065_vm3, %v1064_v11  ;;  %v885_v12 = vld [vmem:[%s1147_s17 + $0x8] sm:$0xff]   ;;  %v854_v13 = vld [vmem:[%s1147_s17] sm:$0xff]   ;;  %v887_v26 = vld [vmem:[%s1147_s17 + $0x18] sm:$0xff]   ;;  %vm1068_vm7 = vmmov (!%p844_p7), 0  }
  0x1b   : > { %v859_v14 = vunpack.c.l.bf16 %v885_v12  ;;  %v860_v15 = vunpack.c.h.bf16 %v885_v12  ;;  %v855_v17 = vunpack.c.l.bf16 %v854_v13  ;;  %v856_v18 = vunpack.c.h.bf16 %v854_v13  ;;  %v886_v28 = vld [vmem:[%s1147_s17 + $0x10] sm:$0xff]   ;;  %v889_v42 = vld [vmem:[%s1147_s17 + $0x28] sm:$0xff]   ;;  %v888_v44 = vld [vmem:[%s1147_s17 + $0x20] sm:$0xff]  }
  0x1c   : > { %916 = vmatmul.mubr.msk.bf16.vlgmr.msra.gmra.mrb[0].mxu0 %vm401_vm2, %v999_v4  ;;  %v867_v30 = vunpack.c.l.bf16 %v887_v26  ;;  %v868_v31 = vunpack.c.h.bf16 %v887_v26  ;;  %v863_v33 = vunpack.c.l.bf16 %v886_v28  ;;  %v864_v34 = vunpack.c.h.bf16 %v886_v28  ;;  %v891_v58 = vld [vmem:[%s1147_s17 + $0x38] sm:$0xff]   ;;  %v890_v60 = vld [vmem:[%s1147_s17 + $0x30] sm:$0xff]   ;;  %v650_v26 = vld [vmem:[%s1241_s6] sm:$0xff] (!%p844_p7) }
  0x1d   : > { %919 = vmatprep.mubr.msk.bf16.mxu0 %vm401_vm2, %v1000_v5  ;;  %v875_v46 = vunpack.c.l.bf16 %v889_v42  ;;  %v876_v47 = vunpack.c.h.bf16 %v889_v42  ;;  %v871_v49 = vunpack.c.l.bf16 %v888_v44  ;;  %v872_v50 = vunpack.c.h.bf16 %v888_v44 }
  0x1e   : > { %v883_v62 = vunpack.c.l.bf16 %v891_v58  ;;  %v884_v63 = vunpack.c.h.bf16 %v891_v58  ;;  %v879_v1 = vunpack.c.l.bf16 %v890_v60  ;;  %v880_v2 = vunpack.c.h.bf16 %v890_v60 }
  0x1f   : > { %v583_v4 = vlaneseq }
  0x21   : > { %v584_v13 = vshrl.u32 %v583_v4, 7 }
  0x24   : > { %920 = vmatmul.mubr.msk.bf16.gmra.mrb[4].mxu0 %vm401_vm2, %v1001_v6 }
  0x25   : > { %923 = vmatprep.mubr.msk.bf16.mxu0 %vm401_vm2, %v1002_v7 }
  0x2c   : > { %924 = vmatmul.mubr.msk.bf16.gmra.mrb[8].mxu0 %vm401_vm2, %v1003_v8 }
  0x2d   : > { %927 = vmatprep.mubr.msk.bf16.mxu0 %vm401_vm2, %v1004_v9 }
  0x34   : > { %928 = vmatmul.mubr.msk.bf16.gmra.mrb[12].mxu0 %vm401_vm2, %v1005_v10 }
  0xef   : > { %v917_v16 = vpop.f32.mrb[0].mxu0 }
  0xf0   : > { %v464_v19 = vpop.f32.mrb[1].mxu0  ;;  %v561_v21 = vmul.f32 %v917_v16, %v859_v14  ;;  %v1066_v16 = vmov 1.0|1.0  }
  0xf1   : > { %v918_v20 = vpop.f32.mrb[2].mxu0  ;;  %v559_v24 = vmul.f32 %v855_v17, %v464_v19  ;;  %v596_v17 = vld [vmem:[#allocation2] sm:$0xff] }
  0xf2   : > { %v562_v22 = vmul.f32 %v918_v20, %v860_v15  ;;  %v467_v23 = vpop.f32.mrb[3].mxu0  ;;  %v841_v15 = vld [vmem:[%s332_s10] ss:$0 sm:$0xff] }
  0xf3   : > { %v560_v25 = vmul.f32 %v856_v18, %v467_v23  ;;  %vm593_vm4 = vcmp.eq.s32.totalorder %v584_v13, %v841_v15  ;;  %v1067_v23 = vmov (!%p844_p7), 0.0  }
  0xf4   : > { %v576_v27 = vpack.c.bf16 %v562_v22, %v561_v21  ;;  %vm842_vm5 = vmpackc.low %vm593_vm4, %vm593_vm4  ;;  %951 = vmatprep.subr.bf16.mxu0 (!%p844_p7), %v1067_v23  ;;  %955 = vmatprep.mubr.msk.bf16.mxu0 (!%p844_p7), %vm1068_vm7, %v1067_v23 }
  0xf5   : > { %v575_v29 = vpack.c.bf16 %v560_v25, %v559_v24  ;;  %v1008_v24 = vld [vmem:[%s1239_s4 + $0x8] sm:$0xff] (!%p844_p7)  }
  0xf7   : > { %v921_v32 = vpop.f32.mrb[4].mxu0  ;;  %932 = vmatpush3.bf16.msra.mxu1 %v575_v29  ;;  %v845_v29 = vld [vmem:[%s1240_s5] ss:$0 sm:$0xff] (!%p844_p7) }
  0xf8   : > { %v480_v35 = vpop.f32.mrb[5].mxu0  ;;  %933 = vmatprep.subr.bf16.mxu1 %v1064_v11  ;;  %v565_v37 = vmul.f32 %v921_v32, %v867_v30 }
  0xf9   : > { %v922_v36 = vpop.f32.mrb[6].mxu0  ;;  %v563_v40 = vmul.f32 %v863_v33, %v480_v35 }
  0xfa   : > { %v566_v38 = vmul.f32 %v922_v36, %v868_v31  ;;  %v483_v39 = vpop.f32.mrb[7].mxu0 }
  0xfb   : > { %v564_v41 = vmul.f32 %v864_v34, %v483_v39  ;;  %934 = vmatpush3.bf16.msra.mxu1 %v576_v27  ;;  %v1069_v27 = vmov (!%p844_p7), 0  }
  0xfc   : > { %v578_v43 = vpack.c.bf16 %v566_v38, %v565_v37  ;;  %935 = vmatprep.subr.bf16.mxu1 %v1064_v11  ;;  %1006 = vset.pattern.permute.xlu0 (!%p844_p7), %v1069_v27 }
  0xfd   : > { %v577_v45 = vpack.c.bf16 %v564_v41, %v563_v40  ;;  %654 = vperm.xlu0 (!%p844_p7), %1006, %v650_v26  }
  0xff   : > { %v925_v48 = vpop.f32.mrb[8].mxu0  ;;  %936 = vmatpush3.bf16.msra.mxu1 %v577_v45 }
 0x100   : > { %v496_v51 = vpop.f32.mrb[9].mxu0  ;;  %937 = vmatprep.subr.bf16.mxu1 %v1064_v11  ;;  %v569_v53 = vmul.f32 %v925_v48, %v875_v46 }
 0x101   : > { %v926_v52 = vpop.f32.mrb[10].mxu0  ;;  %v567_v56 = vmul.f32 %v871_v49, %v496_v51 }
 0x102   : > { %v570_v54 = vmul.f32 %v926_v52, %v876_v47  ;;  %v499_v55 = vpop.f32.mrb[11].mxu0 }
 0x103   : > { %v568_v57 = vmul.f32 %v872_v50, %v499_v55  ;;  %938 = vmatpush3.bf16.msra.mxu1 %v578_v43 }
 0x104   : > { %v580_v59 = vpack.c.bf16 %v570_v54, %v569_v53  ;;  %939 = vmatprep.subr.bf16.mxu1 %v1064_v11 }
 0x105   : > { %v579_v61 = vpack.c.bf16 %v568_v57, %v567_v56 }
 0x107   : > { %v929_v0 = vpop.f32.mrb[12].mxu0  ;;  %940 = vmatpush3.bf16.msra.mxu1 %v579_v61 }
 0x108   : > { %v512_v3 = vpop.f32.mrb[13].mxu0  ;;  %941 = vmatprep.subr.bf16.mxu1 %v1064_v11  ;;  %v573_v6 = vmul.f32 %v929_v0, %v883_v62 }
 0x109   : > { %v930_v5 = vpop.f32.mrb[14].mxu0  ;;  %v571_v9 = vmul.f32 %v879_v1, %v512_v3 }
 0x10a   : > { %v574_v7 = vmul.f32 %v930_v5, %v884_v63  ;;  %v515_v8 = vpop.f32.mrb[15].mxu0 }
 0x10b   : > { %v572_v10 = vmul.f32 %v880_v2, %v515_v8  ;;  %942 = vmatpush3.bf16.msra.mxu1 %v580_v59 }
 0x10c   : > { %v582_v12 = vpack.c.bf16 %v574_v7, %v573_v6  ;;  %943 = vmatprep.subr.bf16.mxu1 %v1064_v11 }
 0x10d   : > { %v581_v14 = vpack.c.bf16 %v572_v10, %v571_v9 }
 0x10f   : > { %944 = vmatpush3.bf16.msra.mxu1 %v581_v14 }
 0x110   : > { %945 = vmatprep.subr.bf16.mxu1 %v1064_v11  ;;  %v1007_v11 = vld [vmem:[%s1239_s4] sm:$0xff] (!%p844_p7)  }
 0x111   : > { %952 = vmatpush3.bf16.msra.mxu0 (!%p844_p7), %v1007_v11 }
 0x112   : > { %953 = vmatprep.subr.bf16.mxu0 (!%p844_p7), %v1067_v23 }
 0x113   : > { %946 = vmatpush3.bf16.msra.mxu1 %v582_v12 }
 0x115   : > { %954 = vmatpush3.bf16.msra.mxu0 (!%p844_p7), %v1008_v24 }
 0x116   : > { %948 = vmatmul.mubr.msk.bf16.vlgmr.msra.gmra.mrb[0].mxu1 %vm842_vm5, %v1066_v16 }
 0x17c   : > { %v655_v30 = vpop.permute.xlu0 (!%p844_p7), %654 }
 0x17d   : > { %v663_v31 = vmul.f32 (!%p844_p7), %v845_v29, %v655_v30 }
 0x1e6   : > { %643 = sbr.rel (%p844_p7) target bundleno = 717 (0x2cd), region = 56 }
 0x1e9   : > { %v631_v18 = vpop.f32.mrb[0].mxu1 }
 0x1ea   : > { %v637_v19 = vadd.f32 %v631_v18, %v596_v17  ;;  %v949_v20 = vpop.f32.mrb[1].mxu1 }
 0x1eb   : > { %v634_v21 = vpop.f32.mrb[2].mxu1 }
 0x1ec   : > { %639 = vst.msk [vmem:[#allocation2] sm:$0xff] %vm638_vm6, %v637_v19  ;;  %v950_v22 = vpop.f32.mrb[3].mxu1 }
 0x1f3   : > { %v644_v25 = vld [vmem:[#allocation2] sm:$0xff] }
 0x1f4   : > { %v645_v28 = vpack.c.bf16 %v644_v25, %v644_v25 }
 0x1f6   : > { %956 = vmatmul.mubr.msk.bf16.vlgmr.msra.gmra.mrb[0].mxu0 %vm638_vm6, %v645_v28 }
 0x2c9   : > { %v713_v32 = vpop.f32.mrb[0].mxu0 }
 0x2ca   : > { %v714_v33 = vadd.f32 %v713_v32, %v663_v31  ;;  %v957_v34 = vpop.f32.mrb[1].mxu0 }
 0x2cb   : > { %v716_v35 = vpop.f32.mrb[2].mxu0 }
 0x2cc   : > { %719 = vst [vmem:[#allocation3] sm:$0xff] %v714_v33  ;;  %v958_v36 = vpop.f32.mrb[3].mxu0 }
 0x2cd PF: > { %p1200_p8 = scmp.eq.s32.totalorder %s815_s27, 3  ;;  %s1070_s12 = smov [#allocation3]  }
 0x2ce   : > { %s729_s13 = sshll.u32 %s1070_s12, 4  ;;  %s730_s13 = int_to_ptr.vmem [resolvable:$true] %s729_s13 }
 0x2cf   : > { %s1009_s14 = scalar_lea.vmem %s730_s13, 128  ;;  %p1016_p12 = scmp.lt.s32.totalorder %s730_s13, %s730_s13 }
 0x2d0   : > { %p1010_p9 = scmp.ne.s32.totalorder %s730_s13, %s1009_s14  ;;  %p1017_p13 = scmp.lt.s32.totalorder %s1009_s14, %s1009_s14 }
 0x2d2   : > { %p1011_p10 = pnand %p1010_p9, %p1200_p8  ;;  %p1018_p0 = por %p1017_p13, %p1016_p12 }
 0x2d4   : > { %p1012_p11 = pneg %p1011_p10 }
 0x2d6   : > { %p1019_p1 = pnand %p1018_p0, %p1012_p11 }
 0x2d8   : > { %1022 = shalt.err (!%p1019_p1)
}
 0x2d9   : > { %s1023_s27 = scalar_lea.hbm %s1242_s7, 128 }
 0x2da   : > { %p1024_p2 = scmp.ne.s32.totalorder %s1242_s7, %s1023_s27  ;;  %p1029_p5 = scmp.lt.u32.totalorder %s1023_s27, %s1242_s7 }
 0x2dc   : > { %p1025_p3 = pnand %p1024_p2, %p1200_p8 }
 0x2de   : > { %p1026_p4 = pneg %p1025_p3 }
 0x2e0   : > { %p1031_p6 = pnand %p1029_p5, %p1026_p4 }
 0x2e2   : > { %1034 = shalt.err (!%p1031_p6)
}
 0x2e3   : > { %961 = dma.vmem_to_hbm [thread:$0]  (%p1200_p8), %s730_s13, 128, %s1242_s7, [#allocation4]  }
 0x2e4   : > { %1048 = dma.done.wait (%p1200_p8), [#allocation4], 128  }
 0x2e5   : > { %1050 = vsyncadd (%p1200_p8), [#allocation4], 4294967168 }
 0x2e6 PF: > { %s18_s26 = sadd.s32 1, %s1061_s26   ;;  %s1244_s24 = smov %s1057_s25 }
 0x2e7   : > { %p15_p7 = scmp.ge.s32.totalorder %s18_s26, 6   ;;  %s1245_s25 = smov %s1247_s28 }
 0x2e9   :  { %17 = sbr.rel (!%p15_p7) target bundleno = 2 (0x2), region = 93 }
 0x2f0   :  { %742 = vsyncpa [#allocation4], 1 }
 0x2f1   :  { %744 = vsyncpa [#allocation4 + $0x1], 1 }

</bundles_post_ra>
